<compile_context>
chip_gen: v7x
topology: tpu7x:2x2x1
jax: 0.10.0
libtpu: 0.0.40
codegen_flags: <defaults>
</compile_context>

<pallas_src>
import jax
import jax.numpy as jnp
from jax.experimental import pallas as pl
from jax.experimental.pallas import tpu as pltpu


def _lsq_kernel(thd_neg, thd_pos):
    def kernel(s_ref, x_ref, o_ref):
        s = s_ref[0]                                   # scalar scale from SMEM
        y = x_ref[...].astype(jnp.float32) / s         # true divide (torch parity)
        y = jnp.clip(y, thd_neg, thd_pos)
        o_ref[...] = (jnp.round(y) * s).astype(o_ref.dtype)
    return kernel


def _round_up(v, m):
    return -(-v // m) * m


def _lsq_quant_2d(x2d, s1, thd_neg, thd_pos, tile_bytes):
    """Run the Pallas kernel on a lane-dense (rows, L) slab."""
    rows, L = x2d.shape
    itemsize = jnp.dtype(x2d.dtype).itemsize
    # Sublane packing alignment: 8 for f32, 16 for bf16/f16, 32 for int8.
    row_align = max(8, 32 // itemsize)
    # Row tile sized by BYTES (~tile_bytes per tile), sublane-aligned.
    tm_cap = max(row_align,
                 (tile_bytes // (L * itemsize)) // row_align * row_align)
    # Guarantee >=2 grid steps when possible so the "parallel" axis shards
    # across both v7x TensorCores (HBM bandwidth is per-TC).
    half_rows_al = _round_up(pl.cdiv(rows, 2), row_align)
    TM = min(tm_cap, half_rows_al, rows)   # TM == rows (full dim) or multiple of 8
    grid = (pl.cdiv(rows, TM),)

    return pl.pallas_call(
        _lsq_kernel(float(thd_neg), float(thd_pos)),
        out_shape=jax.ShapeDtypeStruct((rows, L), x2d.dtype),
        grid=grid,
        in_specs=[
            pl.BlockSpec(memory_space=pltpu.MemorySpace.SMEM),   # scalar s
            pl.BlockSpec((TM, L), lambda i: (i, 0)),             # x tile
        ],
        out_specs=pl.BlockSpec((TM, L), lambda i: (i, 0)),
        compiler_params=pltpu.CompilerParams(
            dimension_semantics=("parallel",),   # megacore / v7x 2-TC sharding
            vmem_limit_bytes=32 << 20,           # 4 buffers x ~4 MiB + headroom
        ),
    )(s1, x2d)


def lsq_quan_forward(x, s, *, bit=8, all_positive=False, symmetric=False,
                     tile_bytes=4 << 20):
    """LsqQuan.forward for per_channel=False (s is a scalar parameter)."""
    # TODO(synk): per_channel=True (one scale per leading-dim slice) and the
    # STE backward (grad_scale / round_pass) are not implemented here.
    if all_positive:
        assert not symmetric, "Positive quantization cannot be symmetric"
        thd_neg, thd_pos = 0, 2 ** bit - 1
    elif symmetric:
        thd_neg, thd_pos = -(2 ** (bit - 1)) + 1, 2 ** (bit - 1) - 1
    else:
        thd_neg, thd_pos = -(2 ** (bit - 1)), 2 ** (bit - 1) - 1

    orig_shape, orig_dtype = x.shape, x.dtype
    n = x.size
    flat = x.reshape(-1)
    s1 = jnp.asarray(s, jnp.float32).reshape(1)

    # Lane width: largest of {512, 256, 128} that divides n exactly (no pad).
    L = next((c for c in (512, 256, 128) if n % c == 0), 0)
    if L:
        n_main = n
    else:
        L = 128                        # aligned prefix; ragged tail < 128 elems
        n_main = (n // L) * L

    pieces = []
    if n_main:
        main = flat if n_main == n else flat[:n_main]
        out2d = _lsq_quant_2d(main.reshape(n_main // L, L),
                              s1, thd_neg, thd_pos, tile_bytes)
        pieces.append(out2d.reshape(-1))
    if n_main < n:
        # Tiny ragged tail (< 128 elements): trivial fused jnp expression.
        t = jnp.clip(flat[n_main:].astype(jnp.float32) / s1[0],
                     thd_neg, thd_pos)
        pieces.append((jnp.round(t) * s1[0]).astype(orig_dtype))

    out_flat = pieces[0] if len(pieces) == 1 else jnp.concatenate(pieces)
    return out_flat.reshape(orig_shape)


if __name__ == "__main__":
    key = jax.random.PRNGKey(0)

    # Small NCHW activation tensor (matches LsqQuan's typical use).
    x = jax.random.normal(key, (2, 4, 16, 16), dtype=jnp.float32)
    s = jnp.ones((1,), dtype=jnp.float32)     # LsqQuan.__init__: s = ones(1)

    bit = 8
    out = jax.block_until_ready(lsq_quan_forward(x, s, bit=bit))

    thd_neg, thd_pos = -(2 ** (bit - 1)), 2 ** (bit - 1) - 1
    ref = jnp.round(jnp.clip(x / s[0], thd_neg, thd_pos)) * s[0]
    assert out.shape == x.shape and out.dtype == x.dtype
    assert jnp.allclose(out, ref, atol=1e-6), "mismatch vs reference"

    # Ragged-size path (no padding: aligned-prefix kernel + tiny jnp tail).
    x2 = 3.0 * jax.random.normal(jax.random.PRNGKey(0), (3, 5, 41),
                                 dtype=jnp.float32)
    s2 = jnp.asarray([0.25], dtype=jnp.float32)
    out2 = jax.block_until_ready(lsq_quan_forward(x2, s2, bit=4))
    tn, tp = -(2 ** 3), 2 ** 3 - 1
    ref2 = jnp.round(jnp.clip(x2 / s2[0], tn, tp)) * s2[0]
    assert out2.shape == x2.shape and out2.dtype == x2.dtype
    assert jnp.allclose(out2, ref2, atol=1e-6), "mismatch vs reference (ragged)"

    print("KERNEL_OK")
</pallas_src>

<mosaic_0001>
module attributes {stable_mosaic.version = 11 : i64} {
  func.func @kernel(%arg0: i32, %arg1: memref<1xf32, #tpu.memory_space<smem>>, %arg2: memref<4x512xf32, #tpu.memory_space<vmem>>, %arg3: memref<4x512xf32, #tpu.memory_space<vmem>>) attributes {dimension_semantics = [#tpu.dimension_semantics<parallel>], iteration_bounds = array<i64: 1>, scalar_prefetch = 0 : i64, scratch_operands = 0 : i64, tpu.core_type = #tpu.core_type<tc>, window_params = [{transform_indices = @transform_0, window_bounds = array<i64: 1>}, {transform_indices = @transform_1, window_bounds = array<i64: 4, 512>}, {transform_indices = @transform_2, window_bounds = array<i64: 4, 512>}]} {
    %c0 = arith.constant 0 : index
    %0 = memref.load %arg1[%c0] : memref<1xf32, #tpu.memory_space<smem>>
    %c0_0 = arith.constant 0 : index
    %c0_1 = arith.constant 0 : index
    %1 = vector.load %arg2[%c0_0, %c0_1] : memref<4x512xf32, #tpu.memory_space<vmem>>, vector<4x512xf32>
    %2 = vector.broadcast %0 : f32 to vector<4x512xf32>
    %3 = arith.divf %1, %2 : vector<4x512xf32>
    %cst = arith.constant -1.280000e+02 : f32
    %cst_2 = arith.constant 1.270000e+02 : f32
    %4 = vector.broadcast %cst : f32 to vector<4x512xf32>
    %5 = arith.maximumf %4, %3 : vector<4x512xf32>
    %6 = vector.broadcast %cst_2 : f32 to vector<4x512xf32>
    %7 = arith.minimumf %6, %5 : vector<4x512xf32>
    %8 = math.roundeven %7 : vector<4x512xf32>
    %9 = vector.broadcast %0 : f32 to vector<4x512xf32>
    %10 = arith.mulf %8, %9 : vector<4x512xf32>
    %c0_3 = arith.constant 0 : index
    %c0_4 = arith.constant 0 : index
    %11 = vector.load %arg3[%c0_3, %c0_4] : memref<4x512xf32, #tpu.memory_space<vmem>>, vector<4x512xf32>
    tpu.vector_store %arg3[%c0_3, %c0_4], %10 {strides = array<i32>} : memref<4x512xf32, #tpu.memory_space<vmem>>, vector<4x512xf32>,
    return
  }
  func.func @transform_0(%arg0: i32) -> i32 {
    %c0_i32 = arith.constant 0 : i32
    %c0_i32_0 = arith.constant 0 : i32
    return %c0_i32 : i32
  }
  func.func @transform_1(%arg0: i32) -> (i32, i32) {
    %c0_i32 = arith.constant 0 : i32
    %c0_i32_0 = arith.constant 0 : i32
    return %arg0, %c0_i32 : i32, i32
  }
  func.func @transform_2(%arg0: i32) -> (i32, i32) {
    %c0_i32 = arith.constant 0 : i32
    %c0_i32_0 = arith.constant 0 : i32
    return %arg0, %c0_i32 : i32, i32
  }
}

</mosaic_0001>

<bundles_post_ra>
// kernel: tpu_custom_call.1
= control target key start
LH: loop header
LB: loop body
LE: loop exit
PB: predicated region body
PF: predicated region fallthrough
CT: control target
= control target key end

     0   :  { %8 = vsyncpa [#allocation4], 0  ;;  %s155_s0 = inlined_call_operand.<no memory space> [shape: f32[1], index: 0, kind: input, shape index: {}]   ;;  %s156_s1 = inlined_call_operand.hbm [shape: f32[4,512], index: 1, kind: input, shape index: {}]   ;;  %s157_s2 = inlined_call_operand.hbm [shape: f32[4,512], index: 2, kind: output, shape index: {}]  }
   0x1   :  { %9 = vsyncpa [#allocation5], 0  ;;  %s111_s9 = smov [#allocation3]   ;;  %s63_s13 = scalar_lea.hbm %s156_s1, 256 }
   0x2   :  { %s18_s10 = sshll.u32 %s111_s9, 4  ;;  %p64_p0 = scmp.ne.s32.totalorder %s156_s1, %s63_s13  ;;  %s19_s10 = int_to_ptr.vmem [resolvable:$true] %s18_s10 }
   0x3   :  { %p67_p1 = scmp.lt.u32.totalorder %s63_s13, %s156_s1 }
   0x5   :  { %p69_p2 = pnand %p67_p1, %p64_p0 }
   0x7   :  { %72 = shalt.err (!%p69_p2)
}
   0x8   :  { %s73_s18 = scalar_lea.vmem %s19_s10, 256  ;;  %p78_p4 = scmp.lt.s32.totalorder %s19_s10, %s19_s10 }
   0x9   :  { %p74_p3 = scmp.ne.s32.totalorder %s19_s10, %s73_s18  ;;  %p79_p5 = scmp.lt.s32.totalorder %s73_s18, %s73_s18 }
   0xb   :  { %p80_p6 = por %p79_p5, %p78_p4 }
   0xd   :  { %p81_p7 = pnand %p80_p6, %p74_p3 }
   0xf   :  { %84 = shalt.err (!%p81_p7)
}
  0x10   :  { %21 = dma.hbm_to_vmem [thread:$0]  %s156_s1, 256, %s19_s10, [#allocation4]  }
  0x11   :  { %107 = dma.done.wait [#allocation4], 256  }
  0x12   :  { %108 = vsyncadd [#allocation4], 4294967040  ;;  %v28_v0 = vstv %s155_s0  ;;  %v26_v1 = vld [vmem:[#allocation3] sm:$0xff]  ;;  %v27_v2 = vld [vmem:[#allocation3 + $0x8] sm:$0xff]  ;;  %s112_s23 = smov [#allocation6]  }
  0x13   :  { %61 = vrcp.f32 %v28_v0  ;;  %s48_s24 = sshll.u32 %s112_s23, 4  ;;  %s49_s24 = int_to_ptr.vmem [resolvable:$true] %s48_s24 }
  0x14   :  { %s85_s0 = scalar_lea.vmem %s49_s24, 256  ;;  %p90_p9 = scmp.lt.s32.totalorder %s49_s24, %s49_s24 }
  0x15   :  { %p86_p8 = scmp.ne.s32.totalorder %s49_s24, %s85_s0  ;;  %p91_p10 = scmp.lt.s32.totalorder %s85_s0, %s85_s0 }
  0x17   :  { %p92_p11 = por %p91_p10, %p90_p9 }
  0x19   :  { %p93_p12 = pnand %p92_p11, %p86_p8 }
  0x1d   :  { %v62_v3 = vpop.eup %61 }
  0x1e   :  { %v30_v4 = vmul.f32 %v62_v3, %v26_v1  ;;  %v31_v5 = vmul.f32 %v62_v3, %v27_v2 }
  0x20   :  { %v32_v6 = vmax.f32 %v30_v4, -128.0  ;;  %v33_v7 = vmax.f32 %v31_v5, -128.0 }
  0x22   :  { %v34_v8 = vmin.f32 %v32_v6, 127.0  ;;  %v35_v9 = vmin.f32 %v33_v7, 127.0 }
  0x24   :  { %v57_v10 = vround.rtne.f32 %v34_v8  ;;  %v58_v11 = vround.rtne.f32 %v35_v9 }
  0x26   :  { %v38_v12 = vmul.f32 %v57_v10, %v28_v0  ;;  %v39_v13 = vmul.f32 %v58_v11, %v28_v0 }
  0x28   :  { %40 = vst [vmem:[#allocation6] sm:$0xff] %v38_v12  ;;  %41 = vst [vmem:[#allocation6 + $0x8] sm:$0xff] %v39_v13 }
  0x29   :  { %96 = shalt.err (!%p93_p12)
}
  0x2a   :  { %s97_s26 = scalar_lea.hbm %s157_s2, 256 }
  0x2b   :  { %p98_p13 = scmp.ne.s32.totalorder %s157_s2, %s97_s26  ;;  %p101_p0 = scmp.lt.u32.totalorder %s97_s26, %s157_s2 }
  0x2d   :  { %p103_p1 = pnand %p101_p0, %p98_p13 }
  0x2f   :  { %106 = shalt.err (!%p103_p1)
}
  0x30   :  { %51 = dma.vmem_to_hbm [thread:$0]  %s49_s24, 256, %s157_s2, [#allocation5]  }
  0x31   :  { %109 = dma.done.wait [#allocation5], 256  }
  0x32   :  { %110 = vsyncadd [#allocation5], 4294967040 }
  0x33   :  { %55 = vsyncpa [#allocation4], 1 }
  0x34   :  { %56 = vsyncpa [#allocation5], 1 }

</bundles_post_ra>
